<compile_context>
chip_gen: v6e
topology: v6e:2x2x1
jax: 0.10.0
libtpu: 0.0.40
codegen_flags: <defaults>
</compile_context>

<pallas_src>
import functools

import jax
import jax.numpy as jnp
from jax import lax
from jax.experimental import pallas as pl
from jax.experimental.pallas import tpu as pltpu


NORM_TEMPERATURE = 50.0
NORM_EPS = 1e-12          # F.normalize default eps
_DELTA_PAD = 128          # lane-dense padded width for the (N, 4) delta output


def _vlm_output_kernel(
    x_ref,      # (tm, D)           compute dtype, flattened ROI features
    wct_ref,    # (D, Z)            cls_score.linear weight, pre-transposed
    bc_ref,     # (1, Z)   f32      cls_score.linear bias
    te_ref,     # (Z, tc)           text-embedding class tile
    w1t_ref,    # (D, D)            bbox_pred[0] weight, pre-transposed
    b1_ref,     # (1, D)   f32      bbox_pred[0] bias
    w2t_ref,    # (D, 128)          bbox_pred[2] weight, transposed + zero-pad
    b2_ref,     # (1, 128) f32      bbox_pred[2] bias, zero-padded
    cls_ref,    # out (tm, tc)      cls dtype (f32 or bf16)
    delta_ref,  # out (tm, 128) f32 (first 4 lanes are the real deltas)
    z_scr,      # scratch (tm, Z)   compute dtype; normalized classifier feats
):
    c = pl.program_id(1)

    @pl.when(c == 0)
    def _():
        x = x_ref[...]

        # ---- TexeEmbedClassifier.linear + 50 * F.normalize(., dim=1) ----
        z = jnp.dot(x, wct_ref[...],
                    preferred_element_type=jnp.float32) + bc_ref[...]
        sumsq = jnp.sum(z * z, axis=1, keepdims=True)
        # 1 / max(||z||, eps) == rsqrt(max(sumsq, eps^2)); rsqrt runs on EUP.
        scale = NORM_TEMPERATURE * lax.rsqrt(
            jnp.maximum(sumsq, NORM_EPS * NORM_EPS))
        z_scr[...] = (z * scale).astype(z_scr.dtype)

        # ---- bbox_pred: Linear -> ReLU -> Linear (once per row tile) ----
        h = jnp.dot(x, w1t_ref[...],
                    preferred_element_type=jnp.float32) + b1_ref[...]
        h = jnp.maximum(h, 0.0).astype(w2t_ref.dtype)
        delta_ref[...] = jnp.dot(
            h, w2t_ref[...], preferred_element_type=jnp.float32) + b2_ref[...]

    # ---- torch.mm(z, text_embed) for this class tile ----
    cls = jnp.dot(z_scr[...], te_ref[...], preferred_element_type=jnp.float32)
    cls_ref[...] = cls.astype(cls_ref.dtype)


def prepare_params(params, compute_dtype=jnp.bfloat16):
    """One-time parameter prep (do NOT redo per call): pre-transpose weights
    to canonical (K, N) MXU layout, cast matmul weights to the compute dtype,
    keep biases in f32, and zero-pad the 4-wide bbox head to 128 output lanes."""
    d = params["bbox_w1"].shape[1]
    w2t = jnp.zeros((d, _DELTA_PAD), compute_dtype).at[:, :4].set(
        params["bbox_w2"].T.astype(compute_dtype))
    b2 = jnp.zeros((1, _DELTA_PAD), jnp.float32).at[0, :4].set(
        params["bbox_b2"].astype(jnp.float32))
    return {
        "wct": params["cls_w"].T.astype(compute_dtype),             # (D, Z)
        "bc": params["cls_b"].reshape(1, -1).astype(jnp.float32),   # (1, Z)
        "w1t": params["bbox_w1"].T.astype(compute_dtype),           # (D, D)
        "b1": params["bbox_b1"].reshape(1, -1).astype(jnp.float32),
        "w2t": w2t,                                                 # (D, 128)
        "b2": b2,                                                   # (1, 128)
    }


def _round_up(v, m):
    return -(-v // m) * m


def _chip_config(n, c_dim, compute_dtype):
    """Per-generation VMEM budget and tile sizes (trace-time query)."""
    try:
        vmem_cap = int(pltpu.get_tpu_info().vmem_capacity_bytes)
    except Exception:  # non-TPU trace / missing attr: assume 128 MiB class
        vmem_cap = 128 * 1024 * 1024

    small_vmem = vmem_cap <= 64 * 1024 * 1024   # v7x-class TensorCore
    if small_vmem:
        # v7x: 64 MiB physical -> leave headroom for compiler scratch + f32
        # intermediates of the c==0 step; 2 TCs share the chip.
        vmem_limit = 52 * 1024 * 1024
        tc_cap = 1024
        tm_cap = 512 if compute_dtype == jnp.bfloat16 else 256
        num_cores = 2
    else:
        # v5e / v6e: 128 MiB physical, 1 TC.
        vmem_limit = 100 * 1024 * 1024
        tc_cap = 4096
        tm_cap = 1024 if compute_dtype == jnp.bfloat16 else 512
        num_cores = 1

    # Row tile.
    if n <= 256:
        tm = n
    else:
        tm = tm_cap
        if num_cores > 1:
            # Ensure >= num_cores row tiles so both TensorCores get work.
            per_core = _round_up(-(-n // num_cores), 256)
            tm = min(tm, per_core)
        tm = min(tm, n)

    # Class tile (bounds resident text-embed block + cls output block).
    tc = c_dim if c_dim <= tc_cap else tc_cap
    return tm, tc, vmem_limit


@functools.partial(jax.jit, static_argnames=("cls_dtype",))
def vlm_fast_rcnn_output_layers(x, text_embed, prep, cls_dtype=jnp.float32):
    """Forward pass. x: (N, C, H, W) or (N, D); text_embed: (Z, num_classes).
    Returns (cls_scores (N, num_classes) cls_dtype, proposal_deltas (N, 4) f32)."""
    if x.ndim > 2:
        x = x.reshape(x.shape[0], -1)           # torch.flatten(x, start_dim=1)
    compute_dtype = prep["wct"].dtype
    x = x.astype(compute_dtype)
    te = text_embed.astype(compute_dtype)

    n, d = x.shape
    z_dim = prep["wct"].shape[1]
    c_dim = te.shape[1]

    tm, tc, vmem_limit = _chip_config(n, c_dim, compute_dtype)
    grid = (pl.cdiv(n, tm), pl.cdiv(c_dim, tc))

    row = lambda shape: pl.BlockSpec(shape, lambda i, c: (i, 0))
    # Constant blocks: fetched once, single-buffered (no wasted double buffer).
    const = lambda shape: pl.BlockSpec(
        shape, lambda i, c: (0, 0), pipeline_mode=pl.Buffered(1))

    cls_scores, delta_pad = pl.pallas_call(
        _vlm_output_kernel,
        out_shape=(
            jax.ShapeDtypeStruct((n, c_dim), cls_dtype),
            jax.ShapeDtypeStruct((n, _DELTA_PAD), jnp.float32),
        ),
        grid=grid,
        in_specs=[
            row((tm, d)),                                     # x tile
            const((d, z_dim)),                                # wc^T (resident)
            const((1, z_dim)),                                # bc
            pl.BlockSpec((z_dim, tc), lambda i, c: (0, c)),   # text-embed tile
            const((d, d)),                                    # w1^T (resident)
            const((1, d)),                                    # b1
            const((d, _DELTA_PAD)),                           # w2^T padded
            const((1, _DELTA_PAD)),                           # b2 padded
        ],
        out_specs=(
            pl.BlockSpec((tm, tc), lambda i, c: (i, c)),      # cls tile
            row((tm, _DELTA_PAD)),                            # delta tile
        ),
        scratch_shapes=[pltpu.VMEM((tm, z_dim), compute_dtype)],
        compiler_params=pltpu.CompilerParams(
            dimension_semantics=("parallel", "arbitrary"),
            vmem_limit_bytes=vmem_limit,
        ),
    )(x, prep["wct"], prep["bc"], te, prep["w1t"], prep["b1"],
      prep["w2t"], prep["b2"])

    return cls_scores, delta_pad[:, :4]


def init_params(key, input_size, zs_weight_dim):
    """Deterministic synthetic parameter init (shapes per module __init__)."""
    k = jax.random.split(key, 6)
    s = 0.02
    return {
        # TexeEmbedClassifier.linear: Linear(input_size, zs_weight_dim)
        "cls_w": s * jax.random.normal(k[0], (zs_weight_dim, input_size), jnp.float32),
        "cls_b": s * jax.random.normal(k[1], (zs_weight_dim,), jnp.float32),
        # bbox_pred: Linear(input_size, input_size) -> ReLU -> Linear(input_size, 4)
        "bbox_w1": s * jax.random.normal(k[2], (input_size, input_size), jnp.float32),
        "bbox_b1": s * jax.random.normal(k[3], (input_size,), jnp.float32),
        "bbox_w2": s * jax.random.normal(k[4], (4, input_size), jnp.float32),
        "bbox_b2": s * jax.random.normal(k[5], (4,), jnp.float32),
    }


def _reference(x, text_embed, params):
    """Pure-JAX f32 reference mirroring the PyTorch forward."""
    if x.ndim > 2:
        x = x.reshape(x.shape[0], -1)
    z = x @ params["cls_w"].T + params["cls_b"]
    norm = jnp.sqrt(jnp.sum(z * z, axis=1, keepdims=True))
    z = NORM_TEMPERATURE * z / jnp.maximum(norm, NORM_EPS)
    cls = z @ text_embed
    h = jnp.maximum(x @ params["bbox_w1"].T + params["bbox_b1"], 0.0)
    deltas = h @ params["bbox_w2"].T + params["bbox_b2"]
    return cls, deltas


if __name__ == "__main__":
    key = jax.random.PRNGKey(0)
    kx, kt, kp = jax.random.split(key, 3)

    # ROI-pooled features: N proposals, C channels, H x W pooled grid (NCHW).
    N, C, H, W = 8, 8, 2, 2
    input_size = C * H * W          # 32
    zs_weight_dim = 64
    num_classes = 16

    x = jax.random.normal(kx, (N, C, H, W), jnp.float32)
    text_embed = jax.random.normal(kt, (zs_weight_dim, num_classes), jnp.float32)
    params = init_params(kp, input_size, zs_weight_dim)
    ref_cls, ref_deltas = _reference(x, text_embed, params)

    # --- default bf16 compute path, f32 cls output (f32 MXU accumulation) ---
    prep_bf16 = prepare_params(params, compute_dtype=jnp.bfloat16)
    cls_scores, proposal_deltas = vlm_fast_rcnn_output_layers(x, text_embed, prep_bf16)
    jax.block_until_ready((cls_scores, proposal_deltas))
    assert cls_scores.shape == (N, num_classes)
    assert proposal_deltas.shape == (N, 4)
    assert jnp.allclose(cls_scores, ref_cls, atol=2.0, rtol=5e-2)
    assert jnp.allclose(proposal_deltas, ref_deltas, atol=1e-2, rtol=5e-2)

    # --- bf16 compute + bf16 cls output (halves cls HBM write traffic) ---
    cls_bf16, deltas_bf16 = vlm_fast_rcnn_output_layers(
        x, text_embed, prep_bf16, cls_dtype=jnp.bfloat16)
    jax.block_until_ready((cls_bf16, deltas_bf16))
    assert cls_bf16.dtype == jnp.bfloat16
    assert jnp.allclose(cls_bf16.astype(jnp.float32), ref_cls, atol=2.0, rtol=5e-2)

    # --- f32 compute path: tight numerical check vs the PyTorch-style reference ---
    prep_f32 = prepare_params(params, compute_dtype=jnp.float32)
    cls_f32, deltas_f32 = vlm_fast_rcnn_output_layers(x, text_embed, prep_f32)
    jax.block_until_ready((cls_f32, deltas_f32))
    assert jnp.allclose(cls_f32, ref_cls, atol=1e-3, rtol=1e-3)
    assert jnp.allclose(deltas_f32, ref_deltas, atol=1e-3, rtol=1e-3)

    print("KERNEL_OK")
</pallas_src>

<mosaic_0001>
module attributes {stable_mosaic.version = 11 : i64} {
  func.func @_vlm_output_kernel(%arg0: i32, %arg1: i32, %arg2: memref<8x32xbf16, #tpu.memory_space<vmem>>, %arg3: memref<32x64xbf16, #tpu.memory_space<vmem>>, %arg4: memref<1x64xf32, #tpu.memory_space<vmem>>, %arg5: memref<64x16xbf16, #tpu.memory_space<vmem>>, %arg6: memref<32x32xbf16, #tpu.memory_space<vmem>>, %arg7: memref<1x32xf32, #tpu.memory_space<vmem>>, %arg8: memref<32x128xbf16, #tpu.memory_space<vmem>>, %arg9: memref<1x128xf32, #tpu.memory_space<vmem>>, %arg10: memref<8x16xf32, #tpu.memory_space<vmem>>, %arg11: memref<8x128xf32, #tpu.memory_space<vmem>>, %arg12: memref<8x64xbf16, #tpu.memory_space<vmem>>) attributes {dimension_semantics = [#tpu.dimension_semantics<parallel>, #tpu.dimension_semantics<arbitrary>], iteration_bounds = array<i64: 1, 1>, scalar_prefetch = 0 : i64, scratch_operands = 1 : i64, tpu.core_type = #tpu.core_type<tc>, window_params = [{transform_indices = @transform_0, window_bounds = array<i64: 8, 32>}, {pipeline_mode = #tpu.pipeline_mode<synchronous>, transform_indices = @transform_1, window_bounds = array<i64: 32, 64>}, {pipeline_mode = #tpu.pipeline_mode<synchronous>, transform_indices = @transform_2, window_bounds = array<i64: 1, 64>}, {transform_indices = @transform_3, window_bounds = array<i64: 64, 16>}, {pipeline_mode = #tpu.pipeline_mode<synchronous>, transform_indices = @transform_4, window_bounds = array<i64: 32, 32>}, {pipeline_mode = #tpu.pipeline_mode<synchronous>, transform_indices = @transform_5, window_bounds = array<i64: 1, 32>}, {pipeline_mode = #tpu.pipeline_mode<synchronous>, transform_indices = @transform_6, window_bounds = array<i64: 32, 128>}, {pipeline_mode = #tpu.pipeline_mode<synchronous>, transform_indices = @transform_7, window_bounds = array<i64: 1, 128>}, {transform_indices = @transform_8, window_bounds = array<i64: 8, 16>}, {transform_indices = @transform_9, window_bounds = array<i64: 8, 128>}]} {
    %c0_i32 = arith.constant 0 : i32
    %0 = arith.cmpi eq, %arg1, %c0_i32 : i32
    %1 = arith.extui %0 : i1 to i32
    %c0_i32_0 = arith.constant 0 : i32
    %2 = arith.cmpi ne, %1, %c0_i32_0 : i32
    scf.if %2 {
      %c0_6 = arith.constant 0 : index
      %c0_7 = arith.constant 0 : index
      %7 = vector.load %arg2[%c0_6, %c0_7] : memref<8x32xbf16, #tpu.memory_space<vmem>>, vector<8x32xbf16>
      %c0_8 = arith.constant 0 : index
      %c0_9 = arith.constant 0 : index
      %8 = vector.load %arg3[%c0_8, %c0_9] : memref<32x64xbf16, #tpu.memory_space<vmem>>, vector<32x64xbf16>
      %cst_10 = arith.constant dense<0.000000e+00> : vector<8x64xf32>
      %9 = tpu.matmul %7, %8, %cst_10 {dimension_numbers = #tpu.dot_dimension_numbers<[1], [0], [0], [1], [0, 0, 1, 1], [], []>} : vector<8x32xbf16>, vector<32x64xbf16>, vector<8x64xf32> -> vector<8x64xf32>
      %c0_11 = arith.constant 0 : index
      %c0_12 = arith.constant 0 : index
      %10 = vector.load %arg4[%c0_11, %c0_12] : memref<1x64xf32, #tpu.memory_space<vmem>>, vector<1x64xf32>
      %11 = vector.broadcast %10 : vector<1x64xf32> to vector<8x64xf32>
      %12 = arith.addf %9, %11 : vector<8x64xf32>
      %13 = arith.mulf %12, %12 : vector<8x64xf32>
      %cst_13 = arith.constant dense<0.000000e+00> : vector<8xf32>
      %14 = vector.multi_reduction <add>, %13, %cst_13 [1] : vector<8x64xf32> to vector<8xf32>
      %15 = vector.shape_cast %14 : vector<8xf32> to vector<8x1xf32>
      %cst_14 = arith.constant 1.000000e-24 : f32
      %16 = vector.broadcast %cst_14 : f32 to vector<8x1xf32>
      %17 = arith.maximumf %15, %16 : vector<8x1xf32>
      %18 = math.rsqrt %17 : vector<8x1xf32>
      %cst_15 = arith.constant 5.000000e+01 : f32
      %19 = vector.broadcast %cst_15 : f32 to vector<8x1xf32>
      %20 = arith.mulf %19, %18 : vector<8x1xf32>
      %21 = vector.broadcast %20 : vector<8x1xf32> to vector<8x64xf32>
      %22 = arith.mulf %12, %21 : vector<8x64xf32>
      %23 = arith.truncf %22 : vector<8x64xf32> to vector<8x64xbf16>
      %c0_16 = arith.constant 0 : index
      %c0_17 = arith.constant 0 : index
      %24 = vector.load %arg12[%c0_16, %c0_17] : memref<8x64xbf16, #tpu.memory_space<vmem>>, vector<8x64xbf16>
      tpu.vector_store %arg12[%c0_16, %c0_17], %23 {strides = array<i32>} : memref<8x64xbf16, #tpu.memory_space<vmem>>, vector<8x64xbf16>,
      %c0_18 = arith.constant 0 : index
      %c0_19 = arith.constant 0 : index
      %25 = vector.load %arg6[%c0_18, %c0_19] : memref<32x32xbf16, #tpu.memory_space<vmem>>, vector<32x32xbf16>
      %cst_20 = arith.constant dense<0.000000e+00> : vector<8x32xf32>
      %26 = tpu.matmul %7, %25, %cst_20 {dimension_numbers = #tpu.dot_dimension_numbers<[1], [0], [0], [1], [0, 0, 1, 1], [], []>} : vector<8x32xbf16>, vector<32x32xbf16>, vector<8x32xf32> -> vector<8x32xf32>
      %c0_21 = arith.constant 0 : index
      %c0_22 = arith.constant 0 : index
      %27 = vector.load %arg7[%c0_21, %c0_22] : memref<1x32xf32, #tpu.memory_space<vmem>>, vector<1x32xf32>
      %28 = vector.broadcast %27 : vector<1x32xf32> to vector<8x32xf32>
      %29 = arith.addf %26, %28 : vector<8x32xf32>
      %cst_23 = arith.constant 0.000000e+00 : f32
      %30 = vector.broadcast %cst_23 : f32 to vector<8x32xf32>
      %31 = arith.maximumf %29, %30 : vector<8x32xf32>
      %32 = arith.truncf %31 : vector<8x32xf32> to vector<8x32xbf16>
      %c0_24 = arith.constant 0 : index
      %c0_25 = arith.constant 0 : index
      %33 = vector.load %arg8[%c0_24, %c0_25] : memref<32x128xbf16, #tpu.memory_space<vmem>>, vector<32x128xbf16>
      %cst_26 = arith.constant dense<0.000000e+00> : vector<8x128xf32>
      %34 = tpu.matmul %32, %33, %cst_26 {dimension_numbers = #tpu.dot_dimension_numbers<[1], [0], [0], [1], [0, 0, 1, 1], [], []>} : vector<8x32xbf16>, vector<32x128xbf16>, vector<8x128xf32> -> vector<8x128xf32>
      %c0_27 = arith.constant 0 : index
      %c0_28 = arith.constant 0 : index
      %35 = vector.load %arg9[%c0_27, %c0_28] : memref<1x128xf32, #tpu.memory_space<vmem>>, vector<1x128xf32>
      %36 = vector.broadcast %35 : vector<1x128xf32> to vector<8x128xf32>
      %37 = arith.addf %34, %36 : vector<8x128xf32>
      %c0_29 = arith.constant 0 : index
      %c0_30 = arith.constant 0 : index
      %38 = vector.load %arg11[%c0_29, %c0_30] : memref<8x128xf32, #tpu.memory_space<vmem>>, vector<8x128xf32>
      tpu.vector_store %arg11[%c0_29, %c0_30], %37 {strides = array<i32>} : memref<8x128xf32, #tpu.memory_space<vmem>>, vector<8x128xf32>,
    } else {
    }
    %c0 = arith.constant 0 : index
    %c0_1 = arith.constant 0 : index
    %3 = vector.load %arg12[%c0, %c0_1] : memref<8x64xbf16, #tpu.memory_space<vmem>>, vector<8x64xbf16>
    %c0_2 = arith.constant 0 : index
    %c0_3 = arith.constant 0 : index
    %4 = vector.load %arg5[%c0_2, %c0_3] : memref<64x16xbf16, #tpu.memory_space<vmem>>, vector<64x16xbf16>
    %cst = arith.constant dense<0.000000e+00> : vector<8x16xf32>
    %5 = tpu.matmul %3, %4, %cst {dimension_numbers = #tpu.dot_dimension_numbers<[1], [0], [0], [1], [0, 0, 1, 1], [], []>} : vector<8x64xbf16>, vector<64x16xbf16>, vector<8x16xf32> -> vector<8x16xf32>
    %c0_4 = arith.constant 0 : index
    %c0_5 = arith.constant 0 : index
    %6 = vector.load %arg10[%c0_4, %c0_5] : memref<8x16xf32, #tpu.memory_space<vmem>>, vector<8x16xf32>
    tpu.vector_store %arg10[%c0_4, %c0_5], %5 {strides = array<i32>} : memref<8x16xf32, #tpu.memory_space<vmem>>, vector<8x16xf32>,
    return
  }
  func.func @transform_0(%arg0: i32, %arg1: i32) -> (i32, i32) {
    %c0_i32 = arith.constant 0 : i32
    %c0_i32_0 = arith.constant 0 : i32
    return %arg0, %c0_i32 : i32, i32
  }
  func.func @transform_1(%arg0: i32, %arg1: i32) -> (i32, i32) {
    %c0_i32 = arith.constant 0 : i32
    %c0_i32_0 = arith.constant 0 : i32
    %c0_i32_1 = arith.constant 0 : i32
    return %c0_i32, %c0_i32_0 : i32, i32
  }
  func.func @transform_2(%arg0: i32, %arg1: i32) -> (i32, i32) {
    %c0_i32 = arith.constant 0 : i32
    %c0_i32_0 = arith.constant 0 : i32
    %c0_i32_1 = arith.constant 0 : i32
    return %c0_i32, %c0_i32_0 : i32, i32
  }
  func.func @transform_3(%arg0: i32, %arg1: i32) -> (i32, i32) {
    %c0_i32 = arith.constant 0 : i32
    %c0_i32_0 = arith.constant 0 : i32
    return %c0_i32, %arg1 : i32, i32
  }
  func.func @transform_4(%arg0: i32, %arg1: i32) -> (i32, i32) {
    %c0_i32 = arith.constant 0 : i32
    %c0_i32_0 = arith.constant 0 : i32
    %c0_i32_1 = arith.constant 0 : i32
    return %c0_i32, %c0_i32_0 : i32, i32
  }
  func.func @transform_5(%arg0: i32, %arg1: i32) -> (i32, i32) {
    %c0_i32 = arith.constant 0 : i32
    %c0_i32_0 = arith.constant 0 : i32
    %c0_i32_1 = arith.constant 0 : i32
    return %c0_i32, %c0_i32_0 : i32, i32
  }
  func.func @transform_6(%arg0: i32, %arg1: i32) -> (i32, i32) {
    %c0_i32 = arith.constant 0 : i32
    %c0_i32_0 = arith.constant 0 : i32
    %c0_i32_1 = arith.constant 0 : i32
    return %c0_i32, %c0_i32_0 : i32, i32
  }
  func.func @transform_7(%arg0: i32, %arg1: i32) -> (i32, i32) {
    %c0_i32 = arith.constant 0 : i32
    %c0_i32_0 = arith.constant 0 : i32
    %c0_i32_1 = arith.constant 0 : i32
    return %c0_i32, %c0_i32_0 : i32, i32
  }
  func.func @transform_8(%arg0: i32, %arg1: i32) -> (i32, i32) {
    %c0_i32 = arith.constant 0 : i32
    return %arg0, %arg1 : i32, i32
  }
  func.func @transform_9(%arg0: i32, %arg1: i32) -> (i32, i32) {
    %c0_i32 = arith.constant 0 : i32
    %c0_i32_0 = arith.constant 0 : i32
    return %arg0, %c0_i32 : i32, i32
  }
}

</mosaic_0001>

<bundles_post_ra>
// kernel: vlm_fast_rcnn_output_layers.1
= control target key start
LH: loop header
LB: loop body
LE: loop exit
PB: predicated region body
PF: predicated region fallthrough
CT: control target
= control target key end

     0   :  { %v450_v1 = vmov 0.0   ;;  %vm451_vm0 = vmmov 0   ;;  %vm61_vm1 = vcmask 261120   ;;  %s560_s0 = inlined_call_operand.vmem [shape: bf16[8,32], index: 0, kind: input, shape index: {}]   ;;  %s561_s1 = inlined_call_operand.vmem [shape: bf16[32,64], index: 1, kind: input, shape index: {}]   ;;  %s562_s2 = inlined_call_operand.vmem [shape: f32[1,64], index: 2, kind: input, shape index: {}]   ;;  %s563_s3 = inlined_call_operand.vmem [shape: bf16[64,16], index: 3, kind: input, shape index: {}]   ;;  %s564_s4 = inlined_call_operand.vmem [shape: bf16[32,32], index: 4, kind: input, shape index: {}]   ;;  %s565_s5 = inlined_call_operand.vmem [shape: f32[1,32], index: 5, kind: input, shape index: {}]   ;;  %s566_s6 = inlined_call_operand.vmem [shape: bf16[32,128], index: 6, kind: input, shape index: {}]   ;;  %s567_s7 = inlined_call_operand.vmem [shape: f32[1,128], index: 7, kind: input, shape index: {}]   ;;  %s568_s8 = inlined_call_operand.hbm [shape: f32[8,16], index: 8, kind: output, shape index: {0}]   ;;  %s569_s9 = inlined_call_operand.vmem [shape: f32[8,128], index: 9, kind: output, shape index: {1}]  }
   0x1   :  { %v416_v0 = vld [vmem:[%s561_s1 + $0x8] sm:$0xff]   ;;  %377 = vmatprep.subr.bf16.mxu0 %v450_v1  ;;  %385 = vmatprep.subr.bf16.mxu1 %v450_v1  ;;  %v417_v2 = vld [vmem:[%s561_s1] sm:$0xff]  }
   0x2   :  { %378 = vmatpush3.bf16.msra.mxu0 %v416_v0  ;;  %381 = vmatprep.mubr.msk.bf16.mxu0 %vm451_vm0, %v450_v1  ;;  %v418_v3 = vld [vmem:[%s564_s4 + $0x8] sm:$0xff]   ;;  %v37_v4 = vld [vmem:[%s560_s0] sm:$0xf] }
   0x3   :  { %379 = vmatprep.subr.bf16.mxu0 %v450_v1  ;;  %389 = vmatprep.mubr.msk.bf16.mxu1 %vm451_vm0, %v450_v1  ;;  %v419_v5 = vld [vmem:[%s564_s4] sm:$0xff]  }
   0x4   :  { %386 = vmatpush3.bf16.msra.mxu1 %v418_v3 }
   0x5   :  { %387 = vmatprep.subr.bf16.mxu1 %v450_v1 }
   0x6   :  { %380 = vmatpush3.bf16.msra.mxu0 %v417_v2 }
   0x7   :  { %393 = vmatprep.subr.bf16.mxu0 %v450_v1 }
   0x8   :  { %388 = vmatpush3.bf16.msra.mxu1 %v419_v5 }
   0x9   :  { %15 = vsyncpa [#allocation4], 0  ;;  %382 = vmatmul.mubr.msk.bf16.vlgmr.msra.gmra.mxu0 %vm61_vm1, %v37_v4  ;;  %401 = vmatprep.subr.bf16.mxu1 %v450_v1  ;;  %v346_v6 = vld [vmem:[%s562_s2] ss:$0 sm:$0xff]  ;;  %vm106_vm2 = vcmask 523264   ;;  %v420_v14 = vld [vmem:[%s563_s3 + $0x18] sm:$0xff]  }
   0xa   :  { %397 = vmatprep.mubr.msk.bf16.mxu0 %vm451_vm0, %v450_v1  ;;  %v421_v15 = vld [vmem:[%s566_s6 + $0x8] sm:$0xff]   ;;  %v350_v16 = vld [vmem:[%s565_s5] ss:$0 sm:$0xff]  ;;  %v422_v18 = vld [vmem:[%s563_s3 + $0x10] sm:$0xff]   ;;  %vm115_vm3 = vcmask 519168   ;;  %s452_s11 = smov [#allocation3]  }
   0xb   :  { %390 = vmatmul.mubr.msk.bf16.vlgmr.msra.gmra.mxu1 %vm61_vm1, %v37_v4  ;;  %394 = vmatpush3.bf16.msra.mxu0 %v421_v15  ;;  %v423_v21 = vld [vmem:[%s566_s6] sm:$0xff]   ;;  %v424_v24 = vld [vmem:[%s563_s3 + $0x8] sm:$0xff]   ;;  %s334_s12 = sshll.u32 %s452_s11, 4  ;;  %vm326_vm4 = vcmask 130048   ;;  %s335_s12 = int_to_ptr.vmem [resolvable:$true] %s334_s12 }
   0xc   :  { %409 = vmatprep.mubr.msk.bf16.mxu1 %vm451_vm0, %v450_v1  ;;  %402 = vmatpush3.bf16.msra.mxu1 %v420_v14  ;;  %v425_v27 = vld [vmem:[%s563_s3] sm:$0xff]   ;;  %s428_s13 = scalar_lea.vmem %s335_s12, 128  ;;  %p433_p1 = scmp.lt.s32.totalorder %s335_s12, %s335_s12 }
   0xd   :  { %403 = vmatprep.subr.bf16.mxu1 %v450_v1  ;;  %395 = vmatprep.subr.bf16.mxu0 %v450_v1  ;;  %v354_v35 = vld [vmem:[%s567_s7] ss:$0 sm:$0xff]  ;;  %p429_p0 = scmp.ne.s32.totalorder %s335_s12, %s428_s13  ;;  %p434_p2 = scmp.lt.s32.totalorder %s428_s13, %s428_s13 }
   0xf   :  { %396 = vmatpush3.bf16.msra.mxu0 %v423_v21  ;;  %p435_p3 = por %p434_p2, %p433_p1 }
  0x10   :  { %404 = vmatpush3.bf16.msra.mxu1 %v422_v18 }
  0x11   :  { %405 = vmatprep.subr.bf16.mxu1 %v450_v1  ;;  %p436_p4 = pnand %p435_p3, %p429_p0 }
  0x14   :  { %406 = vmatpush3.bf16.msra.mxu1 %v424_v24 }
  0x15   :  { %407 = vmatprep.subr.bf16.mxu1 %v450_v1 }
  0x18   :  { %408 = vmatpush3.bf16.msra.mxu1 %v425_v27 }
  0xc9   :  { %v99_v7 = vpop.f32.mrf.mxu0 }
  0xca   :  { %v100_v8 = vadd.f32 %v346_v6, %v99_v7 }
  0xcb   :  { %v383_v9 = vpop.f32.mrf.mxu0  ;;  %v174_v17 = vpop.f32.mrf.mxu1 }
  0xcc   :  { %v105_v10 = vmul.f32 %v100_v8, %v100_v8  ;;  %v175_v19 = vadd.f32 %v350_v16, %v174_v17 }
  0xcd   :  { %v102_v11 = vpop.f32.mrf.mxu0  ;;  %v391_v20 = vpop.f32.mrf.mxu1 }
  0xce   :  { %v107_v12 = vsel %vm106_vm2, %v105_v10, 0.0  ;;  %v180_v22 = vmax.f32 %v175_v19, 0.0 }
  0xcf   :  { %v384_v13 = vpop.f32.mrf.mxu0  ;;  %108 = vadd.xlane.f32.xlu0 %v107_v12  ;;  %v177_v23 = vpop.f32.mrf.mxu1 }
  0xd0   :  { %v181_v25 = vpack.c.bf16 %v180_v22, %v180_v22 }
  0xd1   :  { %v392_v26 = vpop.f32.mrf.mxu1 }
  0xd2   :  { %398 = vmatmul.mubr.msk.bf16.vlgmr.msra.gmra.mxu0 %vm61_vm1, %v181_v25 }
 0x158   :  { %v109_v28 = vpop.xlane.xlu0 %108 }
 0x159   :  { %v110_v29 = vmax.f32 %v109_v28, 1e-24 }
 0x15b   :  { %426 = vrsqrt.f32 %v110_v29 }
 0x168   :  { %v427_v30 = vpop.eup %426 }
 0x169   :  { %v112_v31 = vmul.f32 50.0, %v427_v30 }
 0x16b   :  { %v113_v32 = vmul.f32 %v112_v31, %v100_v8 }
 0x16d   :  { %v114_v33 = vpack.c.bf16 %v113_v32, %v113_v32 }
 0x16f   :  { %116 = vst.msk [vmem:[#allocation2] sm:$0xf] %vm115_vm3, %v114_v33 }
 0x176   :  { %v249_v34 = vld [vmem:[#allocation2] sm:$0xf] }
 0x177   :  { %410 = vmatmul.mubr.msk.bf16.vlgmr.msra.gmra.mxu1 %vm106_vm2, %v249_v34 }
 0x192   :  { %v242_v36 = vpop.f32.mrf.mxu0 }
 0x193   :  { %v243_v37 = vadd.f32 %v354_v35, %v242_v36 }
 0x194   :  { %v399_v38 = vpop.f32.mrf.mxu0 }
 0x195   :  { %248 = vst [vmem:[%s569_s9] sm:$0xff] %v243_v37 }
 0x196   :  { %v245_v39 = vpop.f32.mrf.mxu0 }
 0x198   :  { %v400_v40 = vpop.f32.mrf.mxu0 }
 0x237   :  { %v320_v41 = vpop.f32.mrf.mxu1 }
 0x238   :  { %327 = vst.msk [vmem:[#allocation3] sm:$0xff] %vm326_vm4, %v320_v41 }
 0x239   :  { %v411_v42 = vpop.f32.mrf.mxu1 }
 0x23a   :  { %439 = shalt.err (!%p436_p4)
}
 0x23b   :  { %337 = dma.vmem_to_hbm [thread:$0]  %s335_s12, 128, %s568_s8, [#allocation4]   ;;  %v323_v43 = vpop.f32.mrf.mxu1 }
 0x23d   :  { %v412_v44 = vpop.f32.mrf.mxu1 }
 0x23e   :  { %448 = dma.done.wait [#allocation4], 128  }
 0x23f   :  { %449 = vsyncadd [#allocation4], 4294967168 }
 0x240   :  { %345 = vsyncpa [#allocation4], 1 }

</bundles_post_ra>
